<compile_context>
chip_gen: v6e
topology: v6e:2x2x1
jax: 0.10.0
libtpu: 0.0.40
codegen_flags: <defaults>
</compile_context>

<pallas_src>
import jax
import jax.numpy as jnp
from jax.experimental import pallas as pl
from jax.experimental.pallas import tpu as pltpu


def _linear_kernel(x_ref, w_ref, b_ref, o_ref):
    # x_ref: (tm, Din) f32 — narrowed to bf16 here (VPU work, hidden under
    # the DMA/MXU; avoids a separate wrapper cast pass over x).
    # w_ref: (Din, Dout) bf16, b_ref: (1, Dout) f32, o_ref: (tm, Dout) bf16.
    x_bf = x_ref[...].astype(jnp.bfloat16)
    acc = jnp.dot(x_bf, w_ref[...], preferred_element_type=jnp.float32)
    # f32 accumulate + bias add, bf16 epilogue store (halves writeback traffic).
    o_ref[...] = (acc + b_ref[...]).astype(o_ref.dtype)


def _pick_n_tiles() -> int:
    """Grid depth per TPU generation (see perf review).

    v5e / v6e have a single TensorCore, so grid steps are a serial loop:
    2 tiles buys one step of writeback overlap at minimal per-step cost.
    v7x has 2 TensorCores (megacore): 4 tiles -> 2 steps per core, enabling
    per-core writeback overlap.  Sweep {1, 2, 4} if re-tuning.
    """
    try:
        kind = jax.devices()[0].device_kind.lower()
    except Exception:
        return 2
    return 4 if ("v7" in kind or "7x" in kind) else 2


def child_linear(x, w, b):
    """Child module: y[b, s, :] = x[b, s, :] @ w + bias, on the MXU.

    Flattens [B, S, Din] -> [B*S, Din], pads M up to a multiple of
    8 * n_tiles, splits the M axis into n_tiles parallel slabs, and keeps the
    full weight + bias resident in VMEM via constant index_maps.
    """
    B, S, Din = x.shape
    Dout = w.shape[1]
    M = B * S

    n_tiles = _pick_n_tiles()
    align = 8 * n_tiles                              # tm must be a multiple of 8 sublanes
    M_pad = ((M + align - 1) // align) * align
    tm = M_pad // n_tiles

    # x stays fp32 here; the bf16 narrowing happens inside the kernel.
    x2 = x.reshape(M, Din)
    if M_pad != M:
        x2 = jnp.pad(x2, ((0, M_pad - M), (0, 0)))

    w_bf = w.astype(jnp.bfloat16)                    # tiny one-off pre-cast (kept in wrapper)
    b2 = b.reshape(1, Dout).astype(jnp.float32)      # accept torch-style (Dout,) bias

    # Weight/bias use constant index_maps so they stay VMEM-resident across M
    # tiles (no re-DMA).  Single-buffering them (pipeline_mode=pl.Buffered(1))
    # is the right pattern if the child scales up; negligible at 16 KB today.
    # TODO(synk): if the real child grows (large Din/Dout), add K/N grid axes
    # + an f32 VMEM accumulator and re-budget tiles against v7x's 64 MiB VMEM.
    out2 = pl.pallas_call(
        _linear_kernel,
        out_shape=jax.ShapeDtypeStruct((M_pad, Dout), jnp.bfloat16),
        grid_spec=pltpu.PrefetchScalarGridSpec(
            num_scalar_prefetch=0,
            grid=(n_tiles,),
            in_specs=[
                pl.BlockSpec((tm, Din), lambda i: (i, 0)),    # M tile of x (fp32)
                pl.BlockSpec((Din, Dout), lambda i: (0, 0)),  # full weight (bf16), resident
                pl.BlockSpec((1, Dout), lambda i: (0, 0)),    # bias row (f32), resident
            ],
            out_specs=pl.BlockSpec((tm, Dout), lambda i: (i, 0)),
        ),
        compiler_params=pltpu.CompilerParams(
            dimension_semantics=("parallel",)),
    )(x2, w_bf, b2)

    if M_pad != M:
        out2 = out2[:M]
    return out2.reshape(B, S, Dout)


@jax.jit
def record_single_forward(x, w, b):
    """Equivalent of RecordSingle(child).forward(x)."""
    outputs = child_linear(x, w, b)
    # outputs[..., :512, :] / outputs[..., 512:, :] — slice along dim -2,
    # matching the torch semantics.  The Identity recording hooks are no-ops,
    # so under jit these slices are dead code and cost no extra HBM pass.
    text_output = outputs[..., :512, :]
    image_output = outputs[..., 512:, :]
    del text_output, image_output
    return outputs


if __name__ == "__main__":
    # Small-but-faithful shapes: seq must exceed 512 so image_output is non-empty.
    B, S, D_in, D_out = 2, 528, 64, 128  # 528 = 512 text + 16 image positions

    key = jax.random.PRNGKey(0)
    kx, kw, kb = jax.random.split(key, 3)
    x = jax.random.normal(kx, (B, S, D_in), dtype=jnp.float32)
    # Deterministic child (Linear) parameters, nn.Linear-style scaling,
    # torch-convention 1-D bias.
    w = jax.random.normal(kw, (D_in, D_out), dtype=jnp.float32) / jnp.sqrt(D_in)
    b = jax.random.normal(kb, (D_out,), dtype=jnp.float32) * 0.01

    out = record_single_forward(x, w, b)
    out = jax.block_until_ready(out)
    assert out.shape == (B, S, D_out)
    assert out.dtype == jnp.bfloat16

    out_f32 = out.astype(jnp.float32)

    # Tight check vs a reference that applies the same bf16 operand narrowing
    # (validates the kernel's matmul + bias + epilogue path).
    xb = x.astype(jnp.bfloat16).astype(jnp.float32)
    wb = w.astype(jnp.bfloat16).astype(jnp.float32)
    ref_narrow = xb @ wb + b
    assert jnp.allclose(out_f32, ref_narrow, atol=2e-2, rtol=2e-2)

    # Loose parity check vs the true fp32 Linear, documenting the drift from
    # bf16 operand narrowing + bf16 output (per review's correctness note).
    ref_f32 = x @ w + b
    assert jnp.allclose(out_f32, ref_f32, atol=6e-2, rtol=6e-2)

    print("KERNEL_OK")
</pallas_src>

<mosaic_0001>
module attributes {stable_mosaic.version = 11 : i64} {
  func.func @_linear_kernel(%arg0: i32, %arg1: memref<528x64xf32, #tpu.memory_space<vmem>>, %arg2: memref<64x128xbf16, #tpu.memory_space<vmem>>, %arg3: memref<1x128xf32, #tpu.memory_space<vmem>>, %arg4: memref<528x128xbf16, #tpu.memory_space<vmem>>) attributes {dimension_semantics = [#tpu.dimension_semantics<parallel>], iteration_bounds = array<i64: 2>, scalar_prefetch = 0 : i64, scratch_operands = 0 : i64, tpu.core_type = #tpu.core_type<tc>, window_params = [{transform_indices = @transform_0, window_bounds = array<i64: 528, 64>}, {pipeline_mode = #tpu.pipeline_mode<synchronous>, transform_indices = @transform_1, window_bounds = array<i64: 64, 128>}, {pipeline_mode = #tpu.pipeline_mode<synchronous>, transform_indices = @transform_2, window_bounds = array<i64: 1, 128>}, {transform_indices = @transform_3, window_bounds = array<i64: 528, 128>}]} {
    %c0 = arith.constant 0 : index
    %c0_0 = arith.constant 0 : index
    %0 = vector.load %arg1[%c0, %c0_0] : memref<528x64xf32, #tpu.memory_space<vmem>>, vector<528x64xf32>
    %1 = arith.truncf %0 : vector<528x64xf32> to vector<528x64xbf16>
    %c0_1 = arith.constant 0 : index
    %c0_2 = arith.constant 0 : index
    %2 = vector.load %arg2[%c0_1, %c0_2] : memref<64x128xbf16, #tpu.memory_space<vmem>>, vector<64x128xbf16>
    %cst = arith.constant dense<0.000000e+00> : vector<528x128xf32>
    %3 = tpu.matmul %1, %2, %cst {dimension_numbers = #tpu.dot_dimension_numbers<[1], [0], [0], [1], [0, 0, 1, 1], [], []>} : vector<528x64xbf16>, vector<64x128xbf16>, vector<528x128xf32> -> vector<528x128xf32>
    %c0_3 = arith.constant 0 : index
    %c0_4 = arith.constant 0 : index
    %4 = vector.load %arg3[%c0_3, %c0_4] : memref<1x128xf32, #tpu.memory_space<vmem>>, vector<1x128xf32>
    %5 = vector.broadcast %4 : vector<1x128xf32> to vector<528x128xf32>
    %6 = arith.addf %3, %5 : vector<528x128xf32>
    %7 = arith.truncf %6 : vector<528x128xf32> to vector<528x128xbf16>
    %c0_5 = arith.constant 0 : index
    %c0_6 = arith.constant 0 : index
    %8 = vector.load %arg4[%c0_5, %c0_6] : memref<528x128xbf16, #tpu.memory_space<vmem>>, vector<528x128xbf16>
    tpu.vector_store %arg4[%c0_5, %c0_6], %7 {strides = array<i32>} : memref<528x128xbf16, #tpu.memory_space<vmem>>, vector<528x128xbf16>,
    return
  }
  func.func @transform_0(%arg0: i32) -> (i32, i32) {
    %c0_i32 = arith.constant 0 : i32
    %c0_i32_0 = arith.constant 0 : i32
    return %arg0, %c0_i32 : i32, i32
  }
  func.func @transform_1(%arg0: i32) -> (i32, i32) {
    %c0_i32 = arith.constant 0 : i32
    %c0_i32_0 = arith.constant 0 : i32
    %c0_i32_1 = arith.constant 0 : i32
    return %c0_i32, %c0_i32_0 : i32, i32
  }
  func.func @transform_2(%arg0: i32) -> (i32, i32) {
    %c0_i32 = arith.constant 0 : i32
    %c0_i32_0 = arith.constant 0 : i32
    %c0_i32_1 = arith.constant 0 : i32
    return %c0_i32, %c0_i32_0 : i32, i32
  }
  func.func @transform_3(%arg0: i32) -> (i32, i32) {
    %c0_i32 = arith.constant 0 : i32
    %c0_i32_0 = arith.constant 0 : i32
    return %arg0, %c0_i32 : i32, i32
  }
}

</mosaic_0001>

<bundles_post_ra>
// kernel: record_single_forward.1
= control target key start
LH: loop header
LB: loop body
LE: loop exit
PB: predicated region body
PF: predicated region fallthrough
CT: control target
= control target key end

     0   :  { %8 = vsyncpa [#allocation3], 0  ;;  %s2209_s0 = inlined_call_operand.vmem [shape: f32[1056,64], index: 0, kind: input, shape index: {}]   ;;  %s2210_s1 = inlined_call_operand.vmem [shape: bf16[64,128], index: 1, kind: input, shape index: {}]   ;;  %s2211_s2 = inlined_call_operand.vmem [shape: f32[1,128], index: 2, kind: input, shape index: {}]   ;;  %s2212_s3 = inlined_call_operand.hbm [shape: bf16[1056,128], index: 3, kind: output, shape index: {}]  }
   0x1   :  { %10 = vsyncpa [#allocation3 + $0x1], 0  ;;  %s1810_s12 = smov 0   ;;  %s1812_s13 = smov 0  }
   0x2   :  { %s1814_s14 = smov 0   ;;  %s1816_s15 = smov 0  }
   0x3 LB: > { %s1831_s16 = sadd.s32 4294967295, %s1783_s15   ;;  %s1114_s17 = sadd.s32 4294967294, %s1783_s15   ;;  %s1783_s15 = sphi %s1816_s15, %s2218_s15   ;;  %s1779_s14 = sphi %s1814_s14, %s2217_s14   ;;  %s1775_s13 = sphi %s1812_s13, %s2216_s13   ;;  %s1771_s12 = sphi %s1810_s12, %s2215_s12  }
   0x4   : > { %s1835_s18 = sadd.s32 1, %s1783_s15   ;;  %s91_s19 = sadd.s32 1, %s1779_s14 }
   0x5   : > { %s88_s20 = ssub.s32 %s1783_s15, %s1835_s18  ;;  %p101_p0 = scmp.ne.s32.totalorder %s1779_s14, %s1775_s13 }
   0x6   : > { %p89_p1 = scmp.eq.s32.totalorder %s88_s20, 0  ;;  %p102_p2 = scmp.eq.s32.totalorder %s1831_s16, 1 }
   0x7   : > { %p107_p3 = scmp.ne.s32.totalorder %s1775_s13, %s1771_s12  ;;  %p108_p4 = scmp.eq.s32.totalorder %s1114_s17, 1 }
   0x8   : > { %s1846_s21 = scalar_select %p89_p1, %s1779_s14, %s91_s19  }
   0x9   : > { %p1848_p5 = por %p102_p2, %p101_p0  ;;  %p1852_p6 = por %p108_p4, %p107_p3 }
   0xa   : > { %p1117_p7 = scmp.ge.s32.totalorder %s1783_s15, 1  ;;  %p141_p8 = scmp.lt.s32.totalorder %s1783_s15, 3 }
   0xc   : > { %p142_p9 = pnand %p1117_p7, %p141_p8 }
   0xd   : > { %s165_s28 = smul.u32 (!%p142_p9), 66, %s1831_s16  ;;  %s162_s10 = sand.u32 (!%p142_p9), 1, %s1775_s13  }
   0xe   : > { %145 = sbr.rel (%p142_p9) target bundleno = 379 (0x17b), region = 32  ;;  %s1787_s30 = smov (!%p142_p9), [#allocation2]  }
   0xf   : > { %p166_p10 = scmp.lt.s32.totalorder (!%p142_p9), %s165_s28, 131  ;;  %s1675_s19 = smul.u32 (!%p142_p9), 264, %s162_s10 }
  0x10   : > { %s1292_s24 = smul.u32 (!%p142_p9), 4224, %s1831_s16  ;;  %s2169_s16 = scalar_lea.sflag (!%p142_p9), [#allocation3], %s162_s10 }
  0x11   : > { %s2061_s20 = scalar_lea.vmem (!%p142_p9), [#allocation2], %s1675_s19 }
  0x12   : > { %s1052_s25 = sshll.u32 (!%p142_p9), %s2061_s20, 4  ;;  %s2164_s25 = int_to_ptr.vmem [resolvable:$true] %s1052_s25 }
  0x13   : > { %v1719_v0 = vld [vmem:[%s2210_s1 + $0x18] sm:$0xff]   ;;  %v1785_v1 = vmov 0.0   ;;  %v1720_v2 = vld [vmem:[%s2210_s1 + $0x10] sm:$0xff]   ;;  %vm1786_vm0 = vmmov 0   ;;  %v1721_v3 = vld [vmem:[%s2210_s1 + $0x8] sm:$0xff]   ;;  %s2220_s28 = smov (!%p166_p10, %s165_s28), 131 }
  0x14   : > { %1527 = vmatprep.subr.bf16.mxu0 %v1785_v1  ;;  %1667 = vmatprep.subr.bf16.mxu1 %v1785_v1  ;;  %s1118_s4 = sshll.u32 %s2220_s28, 3  ;;  %v1722_v4 = vld [vmem:[%s2210_s1] sm:$0xff]   ;;  %vm311_vm1 = vcmask 523264   ;;  %s2162_s28 = scalar_lea.hbm %s2212_s3, %s1292_s24 }
  0x15   : > { %1528 = vmatpush3.bf16.msra.mxu0 %v1719_v0  ;;  %1671 = vmatpush3.bf16.msra.mxu1 %v1719_v0  ;;  %s1884_s9 = scalar_lea.vmem %s2209_s0, %s1118_s4  ;;  %s1723_s29 = scalar_lea.vmem %s2164_s25, 4224 }
  0x16   : > { %1529 = vmatprep.subr.bf16.mxu0 %v1785_v1  ;;  %1668 = vmatprep.subr.bf16.mxu1 %v1785_v1  ;;  %v173_v5 = vld [vmem:[%s1884_s9] sm:$0xff]  ;;  %v174_v6 = vld [vmem:[%s1884_s9 + $0x8] sm:$0xff]  ;;  %v207_v7 = vld [vmem:[%s1884_s9 + $0x110] sm:$0xff]  ;;  %p1724_p11 = scmp.ne.s32.totalorder %s2164_s25, %s1723_s29  ;;  %s1727_s4 = sshll.u32 %s1787_s30, 4  ;;  %s1728_s4 = int_to_ptr.vmem [resolvable:$false] %s1727_s4 }
  0x17   : > { %1535 = vmatprep.mubr.msk.bf16.mxu0 %vm1786_vm0, %v1785_v1  ;;  %1603 = vmatprep.mubr.msk.bf16.mxu1 %vm1786_vm0, %v1785_v1  ;;  %v208_v8 = vld [vmem:[%s1884_s9 + $0x118] sm:$0xff]  ;;  %v239_v9 = vpack.c.bf16 %v174_v6, %v173_v5  ;;  %v175_v11 = vld [vmem:[%s1884_s9 + $0x10] sm:$0xff]  ;;  %v209_v13 = vld [vmem:[%s1884_s9 + $0x120] sm:$0xff]  ;;  %s1729_s5 = scalar_lea.vmem %s1728_s4, 8448  ;;  %p1730_p0 = scmp.lt.s32.totalorder %s2164_s25, %s1728_s4 }
  0x18   : > { %v256_v10 = vpack.c.bf16 %v208_v8, %v207_v7  ;;  %v176_v12 = vld [vmem:[%s1884_s9 + $0x18] sm:$0xff]  ;;  %v210_v14 = vld [vmem:[%s1884_s9 + $0x128] sm:$0xff]  ;;  %v177_v17 = vld [vmem:[%s1884_s9 + $0x20] sm:$0xff]  ;;  %p1725_p12 = pnand %p1724_p11, %p1848_p5  ;;  %p1731_p1 = scmp.lt.s32.totalorder %s1729_s5, %s1723_s29 }
  0x19   : > { %1530 = vmatpush3.bf16.msra.mxu0 %v1720_v2  ;;  %1672 = vmatpush3.bf16.msra.mxu1 %v1720_v2  ;;  %v240_v15 = vpack.c.bf16 %v176_v12, %v175_v11  ;;  %v257_v16 = vpack.c.bf16 %v210_v14, %v209_v13  ;;  %v178_v18 = vld [vmem:[%s1884_s9 + $0x28] sm:$0xff]  ;;  %v211_v19 = vld [vmem:[%s1884_s9 + $0x130] sm:$0xff]  ;;  %v212_v20 = vld [vmem:[%s1884_s9 + $0x138] sm:$0xff] }
  0x1a   : > { %1531 = vmatprep.subr.bf16.mxu0 %v1785_v1  ;;  %1669 = vmatprep.subr.bf16.mxu1 %v1785_v1  ;;  %v241_v21 = vpack.c.bf16 %v178_v18, %v177_v17  ;;  %v258_v22 = vpack.c.bf16 %v212_v20, %v211_v19  ;;  %v179_v23 = vld [vmem:[%s1884_s9 + $0x30] sm:$0xff]  ;;  %v180_v24 = vld [vmem:[%s1884_s9 + $0x38] sm:$0xff]  ;;  %v213_v25 = vld [vmem:[%s1884_s9 + $0x140] sm:$0xff]  ;;  %p1726_p13 = pneg %p1725_p12  ;;  %p1732_p2 = por %p1731_p1, %p1730_p0 }
  0x1b   : > { %v214_v26 = vld [vmem:[%s1884_s9 + $0x148] sm:$0xff]  ;;  %v242_v27 = vpack.c.bf16 %v180_v24, %v179_v23  ;;  %v181_v29 = vld [vmem:[%s1884_s9 + $0x40] sm:$0xff]  ;;  %v215_v31 = vld [vmem:[%s1884_s9 + $0x150] sm:$0xff] }
  0x1c   : > { %v259_v28 = vpack.c.bf16 %v214_v26, %v213_v25  ;;  %v182_v30 = vld [vmem:[%s1884_s9 + $0x48] sm:$0xff]  ;;  %v216_v32 = vld [vmem:[%s1884_s9 + $0x158] sm:$0xff]  ;;  %v183_v35 = vld [vmem:[%s1884_s9 + $0x50] sm:$0xff]  ;;  %p1733_p3 = pnand %p1732_p2, %p1726_p13 }
  0x1d   : > { %1532 = vmatpush3.bf16.msra.mxu0 %v1721_v3  ;;  %1673 = vmatpush3.bf16.msra.mxu1 %v1721_v3  ;;  %v243_v33 = vpack.c.bf16 %v182_v30, %v181_v29  ;;  %v260_v34 = vpack.c.bf16 %v216_v32, %v215_v31  ;;  %v184_v36 = vld [vmem:[%s1884_s9 + $0x58] sm:$0xff]  ;;  %v217_v37 = vld [vmem:[%s1884_s9 + $0x160] sm:$0xff]  ;;  %v218_v38 = vld [vmem:[%s1884_s9 + $0x168] sm:$0xff] }
  0x1e   : > { %1533 = vmatprep.subr.bf16.mxu0 %v1785_v1  ;;  %1670 = vmatprep.subr.bf16.mxu1 %v1785_v1  ;;  %v244_v39 = vpack.c.bf16 %v184_v36, %v183_v35  ;;  %v261_v40 = vpack.c.bf16 %v218_v38, %v217_v37  ;;  %v185_v41 = vld [vmem:[%s1884_s9 + $0x60] sm:$0xff]  ;;  %v186_v42 = vld [vmem:[%s1884_s9 + $0x68] sm:$0xff]  ;;  %v219_v43 = vld [vmem:[%s1884_s9 + $0x170] sm:$0xff] }
  0x1f   : > { %v220_v44 = vld [vmem:[%s1884_s9 + $0x178] sm:$0xff]  ;;  %v245_v45 = vpack.c.bf16 %v186_v42, %v185_v41  ;;  %v187_v47 = vld [vmem:[%s1884_s9 + $0x70] sm:$0xff]  ;;  %v221_v49 = vld [vmem:[%s1884_s9 + $0x180] sm:$0xff] }
  0x20   : > { %v262_v46 = vpack.c.bf16 %v220_v44, %v219_v43  ;;  %v188_v48 = vld [vmem:[%s1884_s9 + $0x78] sm:$0xff]  ;;  %v222_v50 = vld [vmem:[%s1884_s9 + $0x188] sm:$0xff]  ;;  %v189_v53 = vld [vmem:[%s1884_s9 + $0x80] sm:$0xff] }
  0x21   : > { %1534 = vmatpush3.bf16.msra.mxu0 %v1722_v4  ;;  %1674 = vmatpush3.bf16.msra.mxu1 %v1722_v4  ;;  %v246_v51 = vpack.c.bf16 %v188_v48, %v187_v47  ;;  %v263_v52 = vpack.c.bf16 %v222_v50, %v221_v49  ;;  %v190_v54 = vld [vmem:[%s1884_s9 + $0x88] sm:$0xff]  ;;  %v223_v55 = vld [vmem:[%s1884_s9 + $0x190] sm:$0xff]  ;;  %v224_v56 = vld [vmem:[%s1884_s9 + $0x198] sm:$0xff] }
  0x22   : > { %v247_v57 = vpack.c.bf16 %v190_v54, %v189_v53  ;;  %v264_v58 = vpack.c.bf16 %v224_v56, %v223_v55  ;;  %v191_v59 = vld [vmem:[%s1884_s9 + $0x90] sm:$0xff]  ;;  %v192_v60 = vld [vmem:[%s1884_s9 + $0x98] sm:$0xff]  ;;  %v225_v61 = vld [vmem:[%s1884_s9 + $0x1a0] sm:$0xff] }
  0x23   : > { %v226_v62 = vld [vmem:[%s1884_s9 + $0x1a8] sm:$0xff]  ;;  %v248_v63 = vpack.c.bf16 %v192_v60, %v191_v59  ;;  %v193_v2 = vld [vmem:[%s1884_s9 + $0xa0] sm:$0xff]  ;;  %v227_v4 = vld [vmem:[%s1884_s9 + $0x1b0] sm:$0xff] }
  0x24   : > { %1536 = vmatmul.mubr.msk.bf16.vlgmr.msra.gmra.mxu0 %vm311_vm1, %v239_v9  ;;  %1604 = vmatmul.mubr.msk.bf16.vlgmr.msra.gmra.mxu1 %vm311_vm1, %v256_v10  ;;  %v265_v0 = vpack.c.bf16 %v226_v62, %v225_v61  ;;  %v194_v3 = vld [vmem:[%s1884_s9 + $0xa8] sm:$0xff]  ;;  %v228_v5 = vld [vmem:[%s1884_s9 + $0x1b8] sm:$0xff]  ;;  %v195_v8 = vld [vmem:[%s1884_s9 + $0xb0] sm:$0xff] }
  0x25   : > { %1539 = vmatprep.mubr.msk.bf16.mxu0 %vm1786_vm0, %v1785_v1  ;;  %1607 = vmatprep.mubr.msk.bf16.mxu1 %vm1786_vm0, %v1785_v1  ;;  %v249_v6 = vpack.c.bf16 %v194_v3, %v193_v2  ;;  %v266_v7 = vpack.c.bf16 %v228_v5, %v227_v4  ;;  %v196_v9 = vld [vmem:[%s1884_s9 + $0xb8] sm:$0xff]  ;;  %v229_v10 = vld [vmem:[%s1884_s9 + $0x1c0] sm:$0xff]  ;;  %v230_v11 = vld [vmem:[%s1884_s9 + $0x1c8] sm:$0xff] }
  0x26   : > { %v250_v12 = vpack.c.bf16 %v196_v9, %v195_v8  ;;  %v267_v13 = vpack.c.bf16 %v230_v11, %v229_v10  ;;  %v197_v14 = vld [vmem:[%s1884_s9 + $0xc0] sm:$0xff]  ;;  %v232_v17 = vld [vmem:[%s1884_s9 + $0x1d8] sm:$0xff]  ;;  %v199_v20 = vld [vmem:[%s1884_s9 + $0xd0] sm:$0xff] }
  0x27   : > { %v234_v23 = vld [vmem:[%s1884_s9 + $0x1e8] sm:$0xff]  ;;  %v201_v26 = vld [vmem:[%s1884_s9 + $0xe0] sm:$0xff]  ;;  %v236_v29 = vld [vmem:[%s1884_s9 + $0x1f8] sm:$0xff] }
  0x28   : > { %v203_v32 = vld [vmem:[%s1884_s9 + $0xf0] sm:$0xff]  ;;  %v238_v35 = vld [vmem:[%s1884_s9 + $0x208] sm:$0xff]  ;;  %v205_v38 = vld [vmem:[%s1884_s9 + $0x100] sm:$0xff] }
  0x29   : > { %v2053_v43 = vld [vmem:[%s2211_s2] ss:$0 sm:$0xff] }
  0x2c   : > { %1540 = vmatmul.mubr.msk.bf16.gmra.mxu0 %vm311_vm1, %v240_v15  ;;  %1608 = vmatmul.mubr.msk.bf16.gmra.mxu1 %vm311_vm1, %v257_v16  ;;  %v198_v15 = vld [vmem:[%s1884_s9 + $0xc8] sm:$0xff]  ;;  %v231_v16 = vld [vmem:[%s1884_s9 + $0x1d0] sm:$0xff] }
  0x2d   : > { %1543 = vmatprep.mubr.msk.bf16.mxu0 %vm1786_vm0, %v1785_v1  ;;  %1611 = vmatprep.mubr.msk.bf16.mxu1 %vm1786_vm0, %v1785_v1  ;;  %v251_v18 = vpack.c.bf16 %v198_v15, %v197_v14  ;;  %v268_v19 = vpack.c.bf16 %v232_v17, %v231_v16 }
  0x34   : > { %1544 = vmatmul.mubr.msk.bf16.gmra.mxu0 %vm311_vm1, %v241_v21  ;;  %1612 = vmatmul.mubr.msk.bf16.gmra.mxu1 %vm311_vm1, %v258_v22  ;;  %v200_v21 = vld [vmem:[%s1884_s9 + $0xd8] sm:$0xff]  ;;  %v233_v22 = vld [vmem:[%s1884_s9 + $0x1e0] sm:$0xff] }
  0x35   : > { %1547 = vmatprep.mubr.msk.bf16.mxu0 %vm1786_vm0, %v1785_v1  ;;  %1615 = vmatprep.mubr.msk.bf16.mxu1 %vm1786_vm0, %v1785_v1  ;;  %v252_v24 = vpack.c.bf16 %v200_v21, %v199_v20  ;;  %v269_v25 = vpack.c.bf16 %v234_v23, %v233_v22 }
  0x3c   : > { %1548 = vmatmul.mubr.msk.bf16.gmra.mxu0 %vm311_vm1, %v242_v27  ;;  %1616 = vmatmul.mubr.msk.bf16.gmra.mxu1 %vm311_vm1, %v259_v28  ;;  %v202_v27 = vld [vmem:[%s1884_s9 + $0xe8] sm:$0xff]  ;;  %v235_v28 = vld [vmem:[%s1884_s9 + $0x1f0] sm:$0xff] }
  0x3d   : > { %1551 = vmatprep.mubr.msk.bf16.mxu0 %vm1786_vm0, %v1785_v1  ;;  %1619 = vmatprep.mubr.msk.bf16.mxu1 %vm1786_vm0, %v1785_v1  ;;  %v253_v30 = vpack.c.bf16 %v202_v27, %v201_v26  ;;  %v270_v31 = vpack.c.bf16 %v236_v29, %v235_v28 }
  0x44   : > { %1552 = vmatmul.mubr.msk.bf16.gmra.mxu0 %vm311_vm1, %v243_v33  ;;  %1620 = vmatmul.mubr.msk.bf16.gmra.mxu1 %vm311_vm1, %v260_v34  ;;  %v204_v33 = vld [vmem:[%s1884_s9 + $0xf8] sm:$0xff]  ;;  %v237_v34 = vld [vmem:[%s1884_s9 + $0x200] sm:$0xff] }
  0x45   : > { %1555 = vmatprep.mubr.msk.bf16.mxu0 %vm1786_vm0, %v1785_v1  ;;  %1623 = vmatprep.mubr.msk.bf16.mxu1 %vm1786_vm0, %v1785_v1  ;;  %v254_v36 = vpack.c.bf16 %v204_v33, %v203_v32  ;;  %v271_v37 = vpack.c.bf16 %v238_v35, %v237_v34 }
  0x4c   : > { %1556 = vmatmul.mubr.msk.bf16.gmra.mxu0 %vm311_vm1, %v244_v39  ;;  %1624 = vmatmul.mubr.msk.bf16.gmra.mxu1 %vm311_vm1, %v261_v40  ;;  %v206_v39 = vld [vmem:[%s1884_s9 + $0x108] sm:$0xff] }
  0x4d   : > { %1559 = vmatprep.mubr.msk.bf16.mxu0 %vm1786_vm0, %v1785_v1  ;;  %1627 = vmatprep.mubr.msk.bf16.mxu1 %vm1786_vm0, %v1785_v1  ;;  %v255_v40 = vpack.c.bf16 %v206_v39, %v205_v38 }
  0x54   : > { %1560 = vmatmul.mubr.msk.bf16.gmra.mxu0 %vm311_vm1, %v245_v45  ;;  %1628 = vmatmul.mubr.msk.bf16.gmra.mxu1 %vm311_vm1, %v262_v46 }
  0x55   : > { %1563 = vmatprep.mubr.msk.bf16.mxu0 %vm1786_vm0, %v1785_v1  ;;  %1631 = vmatprep.mubr.msk.bf16.mxu1 %vm1786_vm0, %v1785_v1 }
  0x5c   : > { %1564 = vmatmul.mubr.msk.bf16.gmra.mxu0 %vm311_vm1, %v246_v51  ;;  %1632 = vmatmul.mubr.msk.bf16.gmra.mxu1 %vm311_vm1, %v263_v52 }
  0x5d   : > { %1567 = vmatprep.mubr.msk.bf16.mxu0 %vm1786_vm0, %v1785_v1  ;;  %1635 = vmatprep.mubr.msk.bf16.mxu1 %vm1786_vm0, %v1785_v1 }
  0x64   : > { %1568 = vmatmul.mubr.msk.bf16.gmra.mxu0 %vm311_vm1, %v247_v57  ;;  %1636 = vmatmul.mubr.msk.bf16.gmra.mxu1 %vm311_vm1, %v264_v58 }
  0x65   : > { %1571 = vmatprep.mubr.msk.bf16.mxu0 %vm1786_vm0, %v1785_v1  ;;  %1639 = vmatprep.mubr.msk.bf16.mxu1 %vm1786_vm0, %v1785_v1 }
  0x6c   : > { %1572 = vmatmul.mubr.msk.bf16.gmra.mxu0 %vm311_vm1, %v248_v63  ;;  %1640 = vmatmul.mubr.msk.bf16.gmra.mxu1 %vm311_vm1, %v265_v0 }
  0x6d   : > { %1575 = vmatprep.mubr.msk.bf16.mxu0 %vm1786_vm0, %v1785_v1  ;;  %1643 = vmatprep.mubr.msk.bf16.mxu1 %vm1786_vm0, %v1785_v1 }
  0x74   : > { %1576 = vmatmul.mubr.msk.bf16.gmra.mxu0 %vm311_vm1, %v249_v6  ;;  %1644 = vmatmul.mubr.msk.bf16.gmra.mxu1 %vm311_vm1, %v266_v7 }
  0x75   : > { %1579 = vmatprep.mubr.msk.bf16.mxu0 %vm1786_vm0, %v1785_v1  ;;  %1647 = vmatprep.mubr.msk.bf16.mxu1 %vm1786_vm0, %v1785_v1 }
  0x7c   : > { %1580 = vmatmul.mubr.msk.bf16.gmra.mxu0 %vm311_vm1, %v250_v12  ;;  %1648 = vmatmul.mubr.msk.bf16.gmra.mxu1 %vm311_vm1, %v267_v13 }
  0x7d   : > { %1583 = vmatprep.mubr.msk.bf16.mxu0 %vm1786_vm0, %v1785_v1  ;;  %1651 = vmatprep.mubr.msk.bf16.mxu1 %vm1786_vm0, %v1785_v1 }
  0x84   : > { %1584 = vmatmul.mubr.msk.bf16.gmra.mxu0 %vm311_vm1, %v251_v18  ;;  %1652 = vmatmul.mubr.msk.bf16.gmra.mxu1 %vm311_vm1, %v268_v19 }
  0x85   : > { %1587 = vmatprep.mubr.msk.bf16.mxu0 %vm1786_vm0, %v1785_v1  ;;  %1655 = vmatprep.mubr.msk.bf16.mxu1 %vm1786_vm0, %v1785_v1 }
  0x8c   : > { %1588 = vmatmul.mubr.msk.bf16.gmra.mxu0 %vm311_vm1, %v252_v24  ;;  %1656 = vmatmul.mubr.msk.bf16.gmra.mxu1 %vm311_vm1, %v269_v25 }
  0x8d   : > { %1591 = vmatprep.mubr.msk.bf16.mxu0 %vm1786_vm0, %v1785_v1  ;;  %1659 = vmatprep.mubr.msk.bf16.mxu1 %vm1786_vm0, %v1785_v1 }
  0x94   : > { %1592 = vmatmul.mubr.msk.bf16.gmra.mxu0 %vm311_vm1, %v253_v30  ;;  %1660 = vmatmul.mubr.msk.bf16.gmra.mxu1 %vm311_vm1, %v270_v31 }
  0x95   : > { %1595 = vmatprep.mubr.msk.bf16.mxu0 %vm1786_vm0, %v1785_v1  ;;  %1663 = vmatprep.mubr.msk.bf16.mxu1 %vm1786_vm0, %v1785_v1 }
  0x9c   : > { %1596 = vmatmul.mubr.msk.bf16.gmra.mxu0 %vm311_vm1, %v254_v36  ;;  %1664 = vmatmul.mubr.msk.bf16.gmra.mxu1 %vm311_vm1, %v271_v37 }
  0x9d   : > { %1599 = vmatprep.mubr.msk.bf16.mxu0 %vm1786_vm0, %v1785_v1 }
  0xa4   : > { %1600 = vmatmul.mubr.msk.bf16.gmra.mxu0 %vm311_vm1, %v255_v40 }
  0xe4   : > { %v445_v41 = vpop.f32.mrf.mxu0  ;;  %v581_v42 = vpop.f32.mrf.mxu1 }
  0xe5   : > { %v582_v46 = vadd.f32 %v2053_v43, %v581_v42  ;;  %v446_v48 = vadd.f32 %v2053_v43, %v445_v41 }
  0xe6   : > { %v1537_v44 = vpop.f32.mrf.mxu0  ;;  %v1605_v45 = vpop.f32.mrf.mxu1 }
  0xe8   : > { %v448_v1 = vpop.f32.mrf.mxu0  ;;  %v584_v47 = vpop.f32.mrf.mxu1 }
  0xe9   : > { %v449_v49 = vadd.f32 %v2053_v43, %v448_v1  ;;  %v585_v50 = vadd.f32 %v2053_v43, %v584_v47 }
  0xea   : > { %v1538_v51 = vpop.f32.mrf.mxu0  ;;  %v1606_v52 = vpop.f32.mrf.mxu1 }
  0xeb   : > { %v1296_v53 = vpack.c.bf16 %v449_v49, %v446_v48  ;;  %v1381_v54 = vpack.c.bf16 %v585_v50, %v582_v46 }
  0xec   : > { %v453_v55 = vpop.f32.mrf.mxu0  ;;  %v589_v56 = vpop.f32.mrf.mxu1 }
  0xed   : > { %1297 = vst [vmem:[%s2061_s20] sm:$0xff] %v1296_v53   ;;  %1474 = vst [vmem:[%s2061_s20 + $0x88] sm:$0xff] %v1381_v54   ;;  %v590_v59 = vadd.f32 %v2053_v43, %v589_v56  ;;  %v454_v62 = vadd.f32 %v2053_v43, %v453_v55 }
  0xee   : > { %v1541_v57 = vpop.f32.mrf.mxu0  ;;  %v1609_v58 = vpop.f32.mrf.mxu1 }
  0xf0   : > { %v456_v60 = vpop.f32.mrf.mxu0  ;;  %v592_v61 = vpop.f32.mrf.mxu1 }
  0xf1   : > { %v457_v63 = vadd.f32 %v2053_v43, %v456_v60  ;;  %v593_v0 = vadd.f32 %v2053_v43, %v592_v61 }
  0xf2   : > { %v1542_v2 = vpop.f32.mrf.mxu0  ;;  %v1610_v3 = vpop.f32.mrf.mxu1 }
  0xf3   : > { %v1301_v4 = vpack.c.bf16 %v457_v63, %v454_v62  ;;  %v1386_v5 = vpack.c.bf16 %v593_v0, %v590_v59 }
  0xf4   : > { %v461_v6 = vpop.f32.mrf.mxu0  ;;  %v597_v7 = vpop.f32.mrf.mxu1 }
  0xf5   : > { %1458 = vst [vmem:[%s2061_s20 + $0x8] sm:$0xff] %v1301_v4   ;;  %1475 = vst [vmem:[%s2061_s20 + $0x90] sm:$0xff] %v1386_v5   ;;  %v598_v10 = vadd.f32 %v2053_v43, %v597_v7  ;;  %v462_v13 = vadd.f32 %v2053_v43, %v461_v6 }
  0xf6   : > { %v1545_v8 = vpop.f32.mrf.mxu0  ;;  %v1613_v9 = vpop.f32.mrf.mxu1 }
  0xf8   : > { %v464_v11 = vpop.f32.mrf.mxu0  ;;  %v600_v12 = vpop.f32.mrf.mxu1 }
  0xf9   : > { %v465_v14 = vadd.f32 %v2053_v43, %v464_v11  ;;  %v601_v15 = vadd.f32 %v2053_v43, %v600_v12 }
  0xfa   : > { %v1546_v16 = vpop.f32.mrf.mxu0  ;;  %v1614_v17 = vpop.f32.mrf.mxu1 }
  0xfb   : > { %v1306_v18 = vpack.c.bf16 %v465_v14, %v462_v13  ;;  %v1391_v19 = vpack.c.bf16 %v601_v15, %v598_v10 }
  0xfc   : > { %v469_v20 = vpop.f32.mrf.mxu0  ;;  %v605_v21 = vpop.f32.mrf.mxu1 }
  0xfd   : > { %1459 = vst [vmem:[%s2061_s20 + $0x10] sm:$0xff] %v1306_v18   ;;  %1476 = vst [vmem:[%s2061_s20 + $0x98] sm:$0xff] %v1391_v19   ;;  %v606_v24 = vadd.f32 %v2053_v43, %v605_v21  ;;  %v470_v27 = vadd.f32 %v2053_v43, %v469_v20 }
  0xfe   : > { %v1549_v22 = vpop.f32.mrf.mxu0  ;;  %v1617_v23 = vpop.f32.mrf.mxu1 }
 0x100   : > { %v472_v25 = vpop.f32.mrf.mxu0  ;;  %v608_v26 = vpop.f32.mrf.mxu1 }
 0x101   : > { %v473_v28 = vadd.f32 %v2053_v43, %v472_v25  ;;  %v609_v29 = vadd.f32 %v2053_v43, %v608_v26 }
 0x102   : > { %v1550_v30 = vpop.f32.mrf.mxu0  ;;  %v1618_v31 = vpop.f32.mrf.mxu1 }
 0x103   : > { %v1311_v32 = vpack.c.bf16 %v473_v28, %v470_v27  ;;  %v1396_v33 = vpack.c.bf16 %v609_v29, %v606_v24 }
 0x104   : > { %v477_v34 = vpop.f32.mrf.mxu0  ;;  %v613_v35 = vpop.f32.mrf.mxu1 }
 0x105   : > { %1460 = vst [vmem:[%s2061_s20 + $0x18] sm:$0xff] %v1311_v32   ;;  %1477 = vst [vmem:[%s2061_s20 + $0xa0] sm:$0xff] %v1396_v33   ;;  %v614_v38 = vadd.f32 %v2053_v43, %v613_v35  ;;  %v478_v41 = vadd.f32 %v2053_v43, %v477_v34 }
 0x106   : > { %v1553_v36 = vpop.f32.mrf.mxu0  ;;  %v1621_v37 = vpop.f32.mrf.mxu1 }
 0x108   : > { %v480_v39 = vpop.f32.mrf.mxu0  ;;  %v616_v40 = vpop.f32.mrf.mxu1 }
 0x109   : > { %v481_v42 = vadd.f32 %v2053_v43, %v480_v39  ;;  %v617_v44 = vadd.f32 %v2053_v43, %v616_v40 }
 0x10a   : > { %v1554_v45 = vpop.f32.mrf.mxu0  ;;  %v1622_v46 = vpop.f32.mrf.mxu1 }
 0x10b   : > { %v1316_v1 = vpack.c.bf16 %v481_v42, %v478_v41  ;;  %v1401_v47 = vpack.c.bf16 %v617_v44, %v614_v38 }
 0x10c   : > { %v485_v48 = vpop.f32.mrf.mxu0  ;;  %v621_v49 = vpop.f32.mrf.mxu1 }
 0x10d   : > { %1461 = vst [vmem:[%s2061_s20 + $0x20] sm:$0xff] %v1316_v1   ;;  %1478 = vst [vmem:[%s2061_s20 + $0xa8] sm:$0xff] %v1401_v47   ;;  %v622_v52 = vadd.f32 %v2053_v43, %v621_v49  ;;  %v486_v55 = vadd.f32 %v2053_v43, %v485_v48 }
 0x10e   : > { %v1557_v50 = vpop.f32.mrf.mxu0  ;;  %v1625_v51 = vpop.f32.mrf.mxu1 }
 0x110   : > { %v488_v53 = vpop.f32.mrf.mxu0  ;;  %v624_v54 = vpop.f32.mrf.mxu1 }
 0x111   : > { %v489_v56 = vadd.f32 %v2053_v43, %v488_v53  ;;  %v625_v57 = vadd.f32 %v2053_v43, %v624_v54 }
 0x112   : > { %v1558_v58 = vpop.f32.mrf.mxu0  ;;  %v1626_v59 = vpop.f32.mrf.mxu1 }
 0x113   : > { %v1321_v60 = vpack.c.bf16 %v489_v56, %v486_v55  ;;  %v1406_v61 = vpack.c.bf16 %v625_v57, %v622_v52 }
 0x114   : > { %v493_v62 = vpop.f32.mrf.mxu0  ;;  %v629_v63 = vpop.f32.mrf.mxu1 }
 0x115   : > { %1462 = vst [vmem:[%s2061_s20 + $0x28] sm:$0xff] %v1321_v60   ;;  %1479 = vst [vmem:[%s2061_s20 + $0xb0] sm:$0xff] %v1406_v61   ;;  %v630_v3 = vadd.f32 %v2053_v43, %v629_v63  ;;  %v494_v6 = vadd.f32 %v2053_v43, %v493_v62 }
 0x116   : > { %v1561_v0 = vpop.f32.mrf.mxu0  ;;  %v1629_v2 = vpop.f32.mrf.mxu1 }
 0x118   : > { %v496_v4 = vpop.f32.mrf.mxu0  ;;  %v632_v5 = vpop.f32.mrf.mxu1 }
 0x119   : > { %v497_v7 = vadd.f32 %v2053_v43, %v496_v4  ;;  %v633_v8 = vadd.f32 %v2053_v43, %v632_v5 }
 0x11a   : > { %v1562_v9 = vpop.f32.mrf.mxu0  ;;  %v1630_v10 = vpop.f32.mrf.mxu1 }
 0x11b   : > { %v1326_v11 = vpack.c.bf16 %v497_v7, %v494_v6  ;;  %v1411_v12 = vpack.c.bf16 %v633_v8, %v630_v3 }
 0x11c   : > { %v501_v13 = vpop.f32.mrf.mxu0  ;;  %v637_v14 = vpop.f32.mrf.mxu1 }
 0x11d   : > { %1463 = vst [vmem:[%s2061_s20 + $0x30] sm:$0xff] %v1326_v11   ;;  %1480 = vst [vmem:[%s2061_s20 + $0xb8] sm:$0xff] %v1411_v12   ;;  %v638_v17 = vadd.f32 %v2053_v43, %v637_v14  ;;  %v502_v20 = vadd.f32 %v2053_v43, %v501_v13 }
 0x11e   : > { %v1565_v15 = vpop.f32.mrf.mxu0  ;;  %v1633_v16 = vpop.f32.mrf.mxu1 }
 0x120   : > { %v504_v18 = vpop.f32.mrf.mxu0  ;;  %v640_v19 = vpop.f32.mrf.mxu1 }
 0x121   : > { %v505_v21 = vadd.f32 %v2053_v43, %v504_v18  ;;  %v641_v22 = vadd.f32 %v2053_v43, %v640_v19 }
 0x122   : > { %v1566_v23 = vpop.f32.mrf.mxu0  ;;  %v1634_v24 = vpop.f32.mrf.mxu1 }
 0x123   : > { %v1331_v25 = vpack.c.bf16 %v505_v21, %v502_v20  ;;  %v1416_v26 = vpack.c.bf16 %v641_v22, %v638_v17 }
 0x124   : > { %v509_v27 = vpop.f32.mrf.mxu0  ;;  %v645_v28 = vpop.f32.mrf.mxu1 }
 0x125   : > { %1464 = vst [vmem:[%s2061_s20 + $0x38] sm:$0xff] %v1331_v25   ;;  %1481 = vst [vmem:[%s2061_s20 + $0xc0] sm:$0xff] %v1416_v26   ;;  %v646_v31 = vadd.f32 %v2053_v43, %v645_v28  ;;  %v510_v34 = vadd.f32 %v2053_v43, %v509_v27 }
 0x126   : > { %v1569_v29 = vpop.f32.mrf.mxu0  ;;  %v1637_v30 = vpop.f32.mrf.mxu1 }
 0x128   : > { %v512_v32 = vpop.f32.mrf.mxu0  ;;  %v648_v33 = vpop.f32.mrf.mxu1 }
 0x129   : > { %v513_v35 = vadd.f32 %v2053_v43, %v512_v32  ;;  %v649_v36 = vadd.f32 %v2053_v43, %v648_v33 }
 0x12a   : > { %v1570_v37 = vpop.f32.mrf.mxu0  ;;  %v1638_v38 = vpop.f32.mrf.mxu1 }
 0x12b   : > { %v1336_v39 = vpack.c.bf16 %v513_v35, %v510_v34  ;;  %v1421_v40 = vpack.c.bf16 %v649_v36, %v646_v31 }
 0x12c   : > { %v517_v41 = vpop.f32.mrf.mxu0  ;;  %v653_v42 = vpop.f32.mrf.mxu1 }
 0x12d   : > { %1465 = vst [vmem:[%s2061_s20 + $0x40] sm:$0xff] %v1336_v39   ;;  %1482 = vst [vmem:[%s2061_s20 + $0xc8] sm:$0xff] %v1421_v40   ;;  %v654_v46 = vadd.f32 %v2053_v43, %v653_v42  ;;  %v518_v48 = vadd.f32 %v2053_v43, %v517_v41 }
 0x12e   : > { %v1573_v44 = vpop.f32.mrf.mxu0  ;;  %v1641_v45 = vpop.f32.mrf.mxu1 }
 0x130   : > { %v520_v1 = vpop.f32.mrf.mxu0  ;;  %v656_v47 = vpop.f32.mrf.mxu1 }
 0x131   : > { %v521_v49 = vadd.f32 %v2053_v43, %v520_v1  ;;  %v657_v50 = vadd.f32 %v2053_v43, %v656_v47 }
 0x132   : > { %v1574_v51 = vpop.f32.mrf.mxu0  ;;  %v1642_v52 = vpop.f32.mrf.mxu1 }
 0x133   : > { %v1341_v53 = vpack.c.bf16 %v521_v49, %v518_v48  ;;  %v1426_v54 = vpack.c.bf16 %v657_v50, %v654_v46 }
 0x134   : > { %v525_v55 = vpop.f32.mrf.mxu0  ;;  %v661_v56 = vpop.f32.mrf.mxu1 }
 0x135   : > { %1466 = vst [vmem:[%s2061_s20 + $0x48] sm:$0xff] %v1341_v53   ;;  %1483 = vst [vmem:[%s2061_s20 + $0xd0] sm:$0xff] %v1426_v54   ;;  %v662_v59 = vadd.f32 %v2053_v43, %v661_v56  ;;  %v526_v62 = vadd.f32 %v2053_v43, %v525_v55 }
 0x136   : > { %v1577_v57 = vpop.f32.mrf.mxu0  ;;  %v1645_v58 = vpop.f32.mrf.mxu1 }
 0x138   : > { %v528_v60 = vpop.f32.mrf.mxu0  ;;  %v664_v61 = vpop.f32.mrf.mxu1 }
 0x139   : > { %v529_v63 = vadd.f32 %v2053_v43, %v528_v60  ;;  %v665_v0 = vadd.f32 %v2053_v43, %v664_v61 }
 0x13a   : > { %v1578_v2 = vpop.f32.mrf.mxu0  ;;  %v1646_v3 = vpop.f32.mrf.mxu1 }
 0x13b   : > { %v1346_v4 = vpack.c.bf16 %v529_v63, %v526_v62  ;;  %v1431_v5 = vpack.c.bf16 %v665_v0, %v662_v59 }
 0x13c   : > { %v533_v6 = vpop.f32.mrf.mxu0  ;;  %v669_v7 = vpop.f32.mrf.mxu1 }
 0x13d   : > { %1467 = vst [vmem:[%s2061_s20 + $0x50] sm:$0xff] %v1346_v4   ;;  %1484 = vst [vmem:[%s2061_s20 + $0xd8] sm:$0xff] %v1431_v5   ;;  %v670_v10 = vadd.f32 %v2053_v43, %v669_v7  ;;  %v534_v13 = vadd.f32 %v2053_v43, %v533_v6 }
 0x13e   : > { %v1581_v8 = vpop.f32.mrf.mxu0  ;;  %v1649_v9 = vpop.f32.mrf.mxu1 }
 0x140   : > { %v536_v11 = vpop.f32.mrf.mxu0  ;;  %v672_v12 = vpop.f32.mrf.mxu1 }
 0x141   : > { %v537_v14 = vadd.f32 %v2053_v43, %v536_v11  ;;  %v673_v15 = vadd.f32 %v2053_v43, %v672_v12 }
 0x142   : > { %v1582_v16 = vpop.f32.mrf.mxu0  ;;  %v1650_v17 = vpop.f32.mrf.mxu1 }
 0x143   : > { %v1351_v18 = vpack.c.bf16 %v537_v14, %v534_v13  ;;  %v1436_v19 = vpack.c.bf16 %v673_v15, %v670_v10 }
 0x144   : > { %v541_v20 = vpop.f32.mrf.mxu0  ;;  %v677_v21 = vpop.f32.mrf.mxu1 }
 0x145   : > { %1468 = vst [vmem:[%s2061_s20 + $0x58] sm:$0xff] %v1351_v18   ;;  %1485 = vst [vmem:[%s2061_s20 + $0xe0] sm:$0xff] %v1436_v19   ;;  %v678_v24 = vadd.f32 %v2053_v43, %v677_v21  ;;  %v542_v27 = vadd.f32 %v2053_v43, %v541_v20 }
 0x146   : > { %v1585_v22 = vpop.f32.mrf.mxu0  ;;  %v1653_v23 = vpop.f32.mrf.mxu1 }
 0x148   : > { %v544_v25 = vpop.f32.mrf.mxu0  ;;  %v680_v26 = vpop.f32.mrf.mxu1 }
 0x149   : > { %v545_v28 = vadd.f32 %v2053_v43, %v544_v25  ;;  %v681_v29 = vadd.f32 %v2053_v43, %v680_v26 }
 0x14a   : > { %v1586_v30 = vpop.f32.mrf.mxu0  ;;  %v1654_v31 = vpop.f32.mrf.mxu1 }
 0x14b   : > { %v1356_v32 = vpack.c.bf16 %v545_v28, %v542_v27  ;;  %v1441_v33 = vpack.c.bf16 %v681_v29, %v678_v24 }
 0x14c   : > { %v549_v34 = vpop.f32.mrf.mxu0  ;;  %v685_v35 = vpop.f32.mrf.mxu1 }
 0x14d   : > { %1469 = vst [vmem:[%s2061_s20 + $0x60] sm:$0xff] %v1356_v32   ;;  %1486 = vst [vmem:[%s2061_s20 + $0xe8] sm:$0xff] %v1441_v33   ;;  %v686_v38 = vadd.f32 %v2053_v43, %v685_v35  ;;  %v550_v41 = vadd.f32 %v2053_v43, %v549_v34 }
 0x14e   : > { %v1589_v36 = vpop.f32.mrf.mxu0  ;;  %v1657_v37 = vpop.f32.mrf.mxu1 }
 0x150   : > { %v552_v39 = vpop.f32.mrf.mxu0  ;;  %v688_v40 = vpop.f32.mrf.mxu1 }
 0x151   : > { %v553_v42 = vadd.f32 %v2053_v43, %v552_v39  ;;  %v689_v44 = vadd.f32 %v2053_v43, %v688_v40 }
 0x152   : > { %v1590_v45 = vpop.f32.mrf.mxu0  ;;  %v1658_v46 = vpop.f32.mrf.mxu1 }
 0x153   : > { %v1361_v1 = vpack.c.bf16 %v553_v42, %v550_v41  ;;  %v1446_v47 = vpack.c.bf16 %v689_v44, %v686_v38 }
 0x154   : > { %v557_v48 = vpop.f32.mrf.mxu0  ;;  %v693_v49 = vpop.f32.mrf.mxu1 }
 0x155   : > { %1470 = vst [vmem:[%s2061_s20 + $0x68] sm:$0xff] %v1361_v1   ;;  %1487 = vst [vmem:[%s2061_s20 + $0xf0] sm:$0xff] %v1446_v47   ;;  %v694_v52 = vadd.f32 %v2053_v43, %v693_v49  ;;  %v558_v55 = vadd.f32 %v2053_v43, %v557_v48 }
 0x156   : > { %v1593_v50 = vpop.f32.mrf.mxu0  ;;  %v1661_v51 = vpop.f32.mrf.mxu1 }
 0x158   : > { %v560_v53 = vpop.f32.mrf.mxu0  ;;  %v696_v54 = vpop.f32.mrf.mxu1 }
 0x159   : > { %v561_v56 = vadd.f32 %v2053_v43, %v560_v53  ;;  %v697_v57 = vadd.f32 %v2053_v43, %v696_v54 }
 0x15a   : > { %v1594_v58 = vpop.f32.mrf.mxu0  ;;  %v1662_v59 = vpop.f32.mrf.mxu1 }
 0x15b   : > { %v1366_v60 = vpack.c.bf16 %v561_v56, %v558_v55  ;;  %v1451_v61 = vpack.c.bf16 %v697_v57, %v694_v52 }
 0x15c   : > { %v565_v62 = vpop.f32.mrf.mxu0  ;;  %v701_v63 = vpop.f32.mrf.mxu1 }
 0x15d   : > { %1471 = vst [vmem:[%s2061_s20 + $0x70] sm:$0xff] %v1366_v60   ;;  %1488 = vst [vmem:[%s2061_s20 + $0xf8] sm:$0xff] %v1451_v61   ;;  %v702_v3 = vadd.f32 %v2053_v43, %v701_v63  ;;  %v566_v6 = vadd.f32 %v2053_v43, %v565_v62 }
 0x15e   : > { %v1597_v0 = vpop.f32.mrf.mxu0  ;;  %v1665_v2 = vpop.f32.mrf.mxu1 }
 0x160   : > { %v568_v4 = vpop.f32.mrf.mxu0  ;;  %v704_v5 = vpop.f32.mrf.mxu1 }
 0x161   : > { %v569_v7 = vadd.f32 %v2053_v43, %v568_v4  ;;  %v705_v8 = vadd.f32 %v2053_v43, %v704_v5 }
 0x162   : > { %v1598_v9 = vpop.f32.mrf.mxu0  ;;  %v1666_v10 = vpop.f32.mrf.mxu1 }
 0x163   : > { %v1371_v11 = vpack.c.bf16 %v569_v7, %v566_v6  ;;  %v1456_v12 = vpack.c.bf16 %v705_v8, %v702_v3 }
 0x164   : > { %v573_v13 = vpop.f32.mrf.mxu0 }
 0x165   : > { %1472 = vst [vmem:[%s2061_s20 + $0x78] sm:$0xff] %v1371_v11   ;;  %1489 = vst [vmem:[%s2061_s20 + $0x100] sm:$0xff] %v1456_v12   ;;  %v574_v16 = vadd.f32 %v2053_v43, %v573_v13 }
 0x166   : > { %v1601_v14 = vpop.f32.mrf.mxu0 }
 0x168   : > { %v576_v15 = vpop.f32.mrf.mxu0 }
 0x169   : > { %v577_v17 = vadd.f32 %v2053_v43, %v576_v15 }
 0x16a   : > { %v1602_v18 = vpop.f32.mrf.mxu0 }
 0x16b   : > { %v1376_v19 = vpack.c.bf16 %v577_v17, %v574_v16 }
 0x16d   : > { %1473 = vst [vmem:[%s2061_s20 + $0x80] sm:$0xff] %v1376_v19  }
 0x16e   : > { %1736 = shalt.err (!%p1733_p3)
}
 0x16f   : > { %s1737_s6 = scalar_lea.hbm %s2162_s28, 4224  ;;  %s1741_s9 = scalar_lea.hbm %s2212_s3, 8448 }
 0x170   : > { %p1738_p4 = scmp.ne.s32.totalorder %s2162_s28, %s1737_s6  ;;  %p1742_p9 = scmp.lt.s32.totalorder %s2162_s28, %s2212_s3 }
 0x171   : > { %p1743_p10 = scmp.lt.s32.totalorder %s1741_s9, %s1737_s6 }
 0x172   : > { %p1739_p7 = pnand %p1738_p4, %p1848_p5 }
 0x173   : > { %p1744_p11 = por %p1743_p10, %p1742_p9 }
 0x174   : > { %p1740_p8 = pneg %p1739_p7 }
 0x176   : > { %p1745_p12 = pnand %p1744_p11, %p1740_p8 }
 0x178   : > { %1748 = shalt.err (!%p1745_p12)
}
 0x179   : > { %s1788_s17 = smov 64   ;;  %s1789_s19 = smov 4  }
 0x17a   : > { %1676 = dma.vmem_to_hbm [thread:$0]  (%p1848_p5), %s2164_s25, 4224, %s2162_s28, %s2169_s16, %s1788_s17, %s1788_s17, %s1789_s19  }
 0x17b PF: > { %p1682_p13 = scmp.ge.s32.totalorder %s1783_s15, 2  ;;  %s1067_s20 = sand.u32 1, %s1771_s12  }
 0x17c   : > { %s1068_s24 = scalar_lea.sflag [#allocation3], %s1067_s20 }
 0x17d   : > { %p1679_p0 = pnand %p1682_p13, %p1852_p6 }
 0x17f   : > { %p1680_p1 = pneg %p1679_p0 }
 0x181   : > { %1766 = dma.done.wait (%p1680_p1), %s1068_s24, 4224  }
 0x182   : > { %1768 = vsyncadd (%p1680_p1), %s1068_s24, 4294963072  ;;  %p13_p2 = scmp.ge.s32.totalorder %s1835_s18, 4   ;;  %s2215_s12 = smov %s1775_s13 }
 0x183   : > { %s2216_s13 = smov %s1779_s14  ;;  %s2217_s14 = smov %s1846_s21 }
 0x184   : > { %s2218_s15 = smov %s1835_s18  ;;  %15 = sbr.rel (!%p13_p2) target bundleno = 3 (0x3), region = 67 }
 0x189   :  { %1073 = vsyncpa [#allocation3], 1 }
 0x18a   :  { %1075 = vsyncpa [#allocation3 + $0x1], 1 }

</bundles_post_ra>
